<compile_context>
chip_gen: v5e
topology: v5e:2x2
jax: 0.10.0
libtpu: 0.0.40
codegen_flags: <defaults>
</compile_context>

<pallas_src>
import functools

import jax
import jax.numpy as jnp
from jax.experimental import pallas as pl
from jax.experimental.pallas import tpu as pltpu


def _round_up(a, b):
    return (a + b - 1) // b * b


def _cdiv(a, b):
    return -(-a // b)


# ----------------------------------------------------------------------------- kernel
def _ae_kernel(x_ref,
               ew1, eb1, ew2, eb2, ew3, eb3,        # encoder   (weights (in,out) bf16, biases (1,out) f32)
               pw1, pb1, pw2, pb2, pw3, pb3,        # predictor
               dw1z, dw1k, db1, dw2, db2, dw3, db3,  # decoder   (dec_w1^T split: zhat-rows / k-rows)
               out_ref):                             # (TB, 128) lane-dense slab: [yhat | zhat | pad]
    f32 = jnp.float32
    bf16 = jnp.bfloat16

    def mm(a, w_ref):
        # bf16 MXU operands, f32 accumulation.
        return jnp.dot(a.astype(bf16), w_ref[...], preferred_element_type=f32)

    x = x_ref[...]  # already bf16 (cast fused with the pad copy in the wrapper)

    # ---- encoder: Linear -> ReLU -> Linear -> ReLU -> Dropout(id) -> Linear ----
    h = jnp.maximum(mm(x, ew1) + eb1[...], 0.0)
    h = jnp.maximum(mm(h, ew2) + eb2[...], 0.0)
    k = mm(h, ew3) + eb3[...]

    # ---- predictor: Linear -> ReLU -> Linear -> ReLU -> Dropout(id) -> Linear --
    p = jnp.maximum(mm(k, pw1) + pb1[...], 0.0)
    p = jnp.maximum(mm(p, pw2) + pb2[...], 0.0)
    zhat = mm(p, pw3) + pb3[...]

    # ---- decoder on concat((zhat, k), dim=1): split-weight form, no concat ----
    d = jnp.maximum(mm(zhat, dw1z) + mm(k, dw1k) + db1[...], 0.0)
    d = jnp.maximum(mm(d, dw2) + db2[...], 0.0)
    yhat = mm(d, dw3) + db3[...]

    # ---- direct sub-slice stores into the lane-dense slab (pad lanes unwritten;
    #      they are stale VMEM and get sliced off in the wrapper) ----
    y = yhat.shape[1]
    z = zhat.shape[1]
    out_ref[:, :y] = yhat.astype(out_ref.dtype)
    out_ref[:, y:y + z] = zhat.astype(out_ref.dtype)


# ----------------------------------------------------------------------------- wrapper
_WEIGHT_NAMES = (
    "ew1", "eb1", "ew2", "eb2", "ew3", "eb3",
    "pw1", "pb1", "pw2", "pb2", "pw3", "pb3",
    "dw1z", "dw1k", "db1", "dw2", "db2", "dw3", "db3",
)


def prepare_params(params, l2_reg):
    """One-time prep: transpose to (in,out), cast weights to bf16, reshape biases,
    split dec_w1^T into zhat / k row-blocks, and pre-compute the x-independent
    regularization scalar."""
    def wT(name):   # (out, in) -> (in, out), bf16 for the MXU
        return jnp.asarray(params[name], jnp.float32).T.astype(jnp.bfloat16)

    def b2d(name):  # (out,) -> (1, out), f32
        return jnp.asarray(params[name], jnp.float32).reshape(1, -1)

    z_dim = params["pred_w3"].shape[0]
    dw1T = wT("dec_w1")   # (z_dim + latent_dim, hidden); rows [:z_dim] hit zhat, rest hit k

    prep = {
        "ew1": wT("enc_w1"), "eb1": b2d("enc_b1"),
        "ew2": wT("enc_w2"), "eb2": b2d("enc_b2"),
        "ew3": wT("enc_w3"), "eb3": b2d("enc_b3"),
        "pw1": wT("pred_w1"), "pb1": b2d("pred_b1"),
        "pw2": wT("pred_w2"), "pb2": b2d("pred_b2"),
        "pw3": wT("pred_w3"), "pb3": b2d("pred_b3"),
        "dw1z": dw1T[:z_dim], "dw1k": dw1T[z_dim:], "db1": b2d("dec_b1"),
        "dw2": wT("dec_w2"), "db2": b2d("dec_b2"),
        "dw3": wT("dec_w3"), "db3": b2d("dec_b3"),
    }
    w0 = jnp.asarray(params["reg_w0"], jnp.float32)
    w1 = jnp.asarray(params["reg_w1"], jnp.float32)
    prep["reg"] = (jnp.sqrt(jnp.sum(w0 * w0)) + jnp.sqrt(jnp.sum(w1 * w1))) * jnp.float32(l2_reg)
    return prep


def _batch_tiling(B, block_b):
    """Tile rows: multiple of 16 (bf16 sublane packing), minimal padding, and
    >= 2 grid steps when the batch is big enough (2 TensorCores on v7x)."""
    n = max(1, _cdiv(B, block_b))
    if n == 1 and B >= 32:
        n = 2
    tb = _round_up(_cdiv(B, n), 16)
    b_pad = _round_up(B, tb)
    return tb, b_pad


@functools.partial(jax.jit, static_argnames=("y_dim", "z_dim", "block_b"))
def autoencoder_forward(x, prep, *, y_dim, z_dim, block_b=1024):
    """Forward pass: returns (yhat, zhat, reg_loss) matching the PyTorch module."""
    B, x_dim = x.shape
    # bf16 input: halves the HBM->VMEM DMA; the first matmul consumes bf16 anyway.
    x = x.astype(jnp.bfloat16)

    tb, b_pad = _batch_tiling(B, block_b)
    if b_pad != B:
        x = jnp.pad(x, ((0, b_pad - B), (0, 0)))
    grid = (b_pad // tb,)

    out_w = _round_up(y_dim + z_dim, 128)   # lane-dense packed output width

    weight_args = tuple(prep[n] for n in _WEIGHT_NAMES)

    def full_block(arr):
        # Whole weight resident in VMEM; constant block index => no per-step re-DMA.
        return pl.BlockSpec(arr.shape, lambda i: (0, 0))

    in_specs = [pl.BlockSpec((tb, x_dim), lambda i: (i, 0))]
    in_specs += [full_block(w) for w in weight_args]

    # Realistic scoped-VMEM request: double-buffered x/out tiles + resident weights
    # + headroom (NOT the whole of a v7x core's 64 MiB).
    weight_bytes = sum(int(w.size) * w.dtype.itemsize for w in weight_args)
    x_tile_bytes = tb * x_dim * 2
    out_tile_bytes = tb * out_w * 4
    vmem_limit = int(2 * (x_tile_bytes + out_tile_bytes + weight_bytes) + (4 << 20))

    slab = pl.pallas_call(
        _ae_kernel,
        grid=grid,
        in_specs=in_specs,
        out_specs=pl.BlockSpec((tb, out_w), lambda i: (i, 0)),
        out_shape=jax.ShapeDtypeStruct((b_pad, out_w), jnp.float32),
        compiler_params=pltpu.CompilerParams(
            dimension_semantics=("parallel",),
            vmem_limit_bytes=vmem_limit,
        ),
    )(x, *weight_args)

    yhat = slab[:B, :y_dim]
    zhat = slab[:B, y_dim:y_dim + z_dim]
    return yhat, zhat, prep["reg"]


# ----------------------------------------------------------------------------- params / reference
def _init_linear(key, out_dim, in_dim):
    # Deterministic init mimicking torch.nn.Linear default (U(-1/sqrt(in), 1/sqrt(in))).
    kw, kb = jax.random.split(key)
    bound = 1.0 / jnp.sqrt(jnp.float32(in_dim))
    w = jax.random.uniform(kw, (out_dim, in_dim), jnp.float32, -bound, bound)
    b = jax.random.uniform(kb, (out_dim,), jnp.float32, -bound, bound)
    return w, b


def make_params(key, x_dim, y_dim, z_dim, hidden_dim, latent_dim):
    keys = jax.random.split(key, 12)
    p = {}
    p["enc_w1"], p["enc_b1"] = _init_linear(keys[0], hidden_dim, x_dim)
    p["enc_w2"], p["enc_b2"] = _init_linear(keys[1], hidden_dim, hidden_dim)
    p["enc_w3"], p["enc_b3"] = _init_linear(keys[2], latent_dim, hidden_dim)
    p["pred_w1"], p["pred_b1"] = _init_linear(keys[3], hidden_dim, latent_dim)
    p["pred_w2"], p["pred_b2"] = _init_linear(keys[4], hidden_dim, hidden_dim)
    p["pred_w3"], p["pred_b3"] = _init_linear(keys[5], z_dim, hidden_dim)
    p["dec_w1"], p["dec_b1"] = _init_linear(keys[6], hidden_dim, latent_dim + z_dim)
    p["dec_w2"], p["dec_b2"] = _init_linear(keys[7], hidden_dim, hidden_dim)
    p["dec_w3"], p["dec_b3"] = _init_linear(keys[8], y_dim, hidden_dim)
    p["reg_w0"], _ = _init_linear(keys[9], hidden_dim, hidden_dim)
    p["reg_w1"], _ = _init_linear(keys[10], latent_dim, latent_dim)
    return p


def reference_forward(x, p, l2_reg):
    # Pure-JAX f32 reference (PyTorch semantics, dropout = identity in eval).
    def lin(v, w, b):
        return v @ w.T + b
    h = jax.nn.relu(lin(x, p["enc_w1"], p["enc_b1"]))
    h = jax.nn.relu(lin(h, p["enc_w2"], p["enc_b2"]))
    k = lin(h, p["enc_w3"], p["enc_b3"])
    q = jax.nn.relu(lin(k, p["pred_w1"], p["pred_b1"]))
    q = jax.nn.relu(lin(q, p["pred_w2"], p["pred_b2"]))
    zhat = lin(q, p["pred_w3"], p["pred_b3"])
    concat = jnp.concatenate([zhat, k], axis=1)
    d = jax.nn.relu(lin(concat, p["dec_w1"], p["dec_b1"]))
    d = jax.nn.relu(lin(d, p["dec_w2"], p["dec_b2"]))
    yhat = lin(d, p["dec_w3"], p["dec_b3"])
    reg = (jnp.linalg.norm(p["reg_w0"]) + jnp.linalg.norm(p["reg_w1"])) * l2_reg
    return yhat, zhat, reg


# ----------------------------------------------------------------------------- demo
if __name__ == "__main__":
    # Small shapes consistent with the module's forward (tabular vectors).
    X_dim, Y_dim, Z_dim = 32, 16, 8
    hidden_dim, latent_dim = 128, 32
    dropout_rate, l2_reg = 0.1, 1e-4   # dropout unused at inference

    key = jax.random.PRNGKey(0)
    kx, kp = jax.random.split(key)
    params = make_params(kp, X_dim, Y_dim, Z_dim, hidden_dim, latent_dim)
    prep = prepare_params(params, l2_reg)           # one-time weight prep (off hot path)

    # Two batch sizes: single-tile path and the padded multi-step (grid=2) path.
    for B in (8, 40):
        x = jax.random.normal(jax.random.fold_in(kx, B), (B, X_dim), jnp.float32)
        yhat, zhat, reg = autoencoder_forward(x, prep, y_dim=Y_dim, z_dim=Z_dim)
        jax.block_until_ready((yhat, zhat, reg))

        yref, zref, rref = reference_forward(x, params, l2_reg)
        # bf16 MXU operands vs f32 reference -> loose-but-tight-enough tolerances.
        assert yhat.shape == (B, Y_dim) and zhat.shape == (B, Z_dim)
        assert jnp.allclose(yhat, yref, atol=5e-2, rtol=5e-2), float(jnp.max(jnp.abs(yhat - yref)))
        assert jnp.allclose(zhat, zref, atol=5e-2, rtol=5e-2), float(jnp.max(jnp.abs(zhat - zref)))
        assert jnp.allclose(reg, rref, atol=1e-5, rtol=1e-5)

    print("KERNEL_OK")
</pallas_src>

<mosaic_0001>
module attributes {stable_mosaic.version = 11 : i64} {
  func.func @_ae_kernel(%arg0: i32, %arg1: memref<16x32xbf16, #tpu.memory_space<vmem>>, %arg2: memref<32x128xbf16, #tpu.memory_space<vmem>>, %arg3: memref<1x128xf32, #tpu.memory_space<vmem>>, %arg4: memref<128x128xbf16, #tpu.memory_space<vmem>>, %arg5: memref<1x128xf32, #tpu.memory_space<vmem>>, %arg6: memref<128x32xbf16, #tpu.memory_space<vmem>>, %arg7: memref<1x32xf32, #tpu.memory_space<vmem>>, %arg8: memref<32x128xbf16, #tpu.memory_space<vmem>>, %arg9: memref<1x128xf32, #tpu.memory_space<vmem>>, %arg10: memref<128x128xbf16, #tpu.memory_space<vmem>>, %arg11: memref<1x128xf32, #tpu.memory_space<vmem>>, %arg12: memref<128x8xbf16, #tpu.memory_space<vmem>>, %arg13: memref<1x8xf32, #tpu.memory_space<vmem>>, %arg14: memref<8x128xbf16, #tpu.memory_space<vmem>>, %arg15: memref<32x128xbf16, #tpu.memory_space<vmem>>, %arg16: memref<1x128xf32, #tpu.memory_space<vmem>>, %arg17: memref<128x128xbf16, #tpu.memory_space<vmem>>, %arg18: memref<1x128xf32, #tpu.memory_space<vmem>>, %arg19: memref<128x16xbf16, #tpu.memory_space<vmem>>, %arg20: memref<1x16xf32, #tpu.memory_space<vmem>>, %arg21: memref<16x128xf32, #tpu.memory_space<vmem>>) attributes {dimension_semantics = [#tpu.dimension_semantics<parallel>], iteration_bounds = array<i64: 1>, scalar_prefetch = 0 : i64, scratch_operands = 0 : i64, tpu.core_type = #tpu.core_type<tc>, window_params = [{transform_indices = @transform_0, window_bounds = array<i64: 16, 32>}, {pipeline_mode = #tpu.pipeline_mode<synchronous>, transform_indices = @transform_1, window_bounds = array<i64: 32, 128>}, {pipeline_mode = #tpu.pipeline_mode<synchronous>, transform_indices = @transform_2, window_bounds = array<i64: 1, 128>}, {pipeline_mode = #tpu.pipeline_mode<synchronous>, transform_indices = @transform_3, window_bounds = array<i64: 128, 128>}, {pipeline_mode = #tpu.pipeline_mode<synchronous>, transform_indices = @transform_4, window_bounds = array<i64: 1, 128>}, {pipeline_mode = #tpu.pipeline_mode<synchronous>, transform_indices = @transform_5, window_bounds = array<i64: 128, 32>}, {pipeline_mode = #tpu.pipeline_mode<synchronous>, transform_indices = @transform_6, window_bounds = array<i64: 1, 32>}, {pipeline_mode = #tpu.pipeline_mode<synchronous>, transform_indices = @transform_7, window_bounds = array<i64: 32, 128>}, {pipeline_mode = #tpu.pipeline_mode<synchronous>, transform_indices = @transform_8, window_bounds = array<i64: 1, 128>}, {pipeline_mode = #tpu.pipeline_mode<synchronous>, transform_indices = @transform_9, window_bounds = array<i64: 128, 128>}, {pipeline_mode = #tpu.pipeline_mode<synchronous>, transform_indices = @transform_10, window_bounds = array<i64: 1, 128>}, {pipeline_mode = #tpu.pipeline_mode<synchronous>, transform_indices = @transform_11, window_bounds = array<i64: 128, 8>}, {pipeline_mode = #tpu.pipeline_mode<synchronous>, transform_indices = @transform_12, window_bounds = array<i64: 1, 8>}, {pipeline_mode = #tpu.pipeline_mode<synchronous>, transform_indices = @transform_13, window_bounds = array<i64: 8, 128>}, {pipeline_mode = #tpu.pipeline_mode<synchronous>, transform_indices = @transform_14, window_bounds = array<i64: 32, 128>}, {pipeline_mode = #tpu.pipeline_mode<synchronous>, transform_indices = @transform_15, window_bounds = array<i64: 1, 128>}, {pipeline_mode = #tpu.pipeline_mode<synchronous>, transform_indices = @transform_16, window_bounds = array<i64: 128, 128>}, {pipeline_mode = #tpu.pipeline_mode<synchronous>, transform_indices = @transform_17, window_bounds = array<i64: 1, 128>}, {pipeline_mode = #tpu.pipeline_mode<synchronous>, transform_indices = @transform_18, window_bounds = array<i64: 128, 16>}, {pipeline_mode = #tpu.pipeline_mode<synchronous>, transform_indices = @transform_19, window_bounds = array<i64: 1, 16>}, {transform_indices = @transform_20, window_bounds = array<i64: 16, 128>}]} {
    %c0 = arith.constant 0 : index
    %c0_0 = arith.constant 0 : index
    %0 = vector.load %arg1[%c0, %c0_0] : memref<16x32xbf16, #tpu.memory_space<vmem>>, vector<16x32xbf16>
    %c0_1 = arith.constant 0 : index
    %c0_2 = arith.constant 0 : index
    %1 = vector.load %arg2[%c0_1, %c0_2] : memref<32x128xbf16, #tpu.memory_space<vmem>>, vector<32x128xbf16>
    %cst = arith.constant dense<0.000000e+00> : vector<16x128xf32>
    %2 = tpu.matmul %0, %1, %cst {dimension_numbers = #tpu.dot_dimension_numbers<[1], [0], [0], [1], [0, 0, 1, 1], [], []>} : vector<16x32xbf16>, vector<32x128xbf16>, vector<16x128xf32> -> vector<16x128xf32>
    %c0_3 = arith.constant 0 : index
    %c0_4 = arith.constant 0 : index
    %3 = vector.load %arg3[%c0_3, %c0_4] : memref<1x128xf32, #tpu.memory_space<vmem>>, vector<1x128xf32>
    %4 = vector.broadcast %3 : vector<1x128xf32> to vector<16x128xf32>
    %5 = arith.addf %2, %4 : vector<16x128xf32>
    %cst_5 = arith.constant 0.000000e+00 : f32
    %6 = vector.broadcast %cst_5 : f32 to vector<16x128xf32>
    %7 = arith.maximumf %5, %6 : vector<16x128xf32>
    %8 = arith.truncf %7 : vector<16x128xf32> to vector<16x128xbf16>
    %c0_6 = arith.constant 0 : index
    %c0_7 = arith.constant 0 : index
    %9 = vector.load %arg4[%c0_6, %c0_7] : memref<128x128xbf16, #tpu.memory_space<vmem>>, vector<128x128xbf16>
    %cst_8 = arith.constant dense<0.000000e+00> : vector<16x128xf32>
    %10 = tpu.matmul %8, %9, %cst_8 {dimension_numbers = #tpu.dot_dimension_numbers<[1], [0], [0], [1], [0, 0, 1, 1], [], []>} : vector<16x128xbf16>, vector<128x128xbf16>, vector<16x128xf32> -> vector<16x128xf32>
    %c0_9 = arith.constant 0 : index
    %c0_10 = arith.constant 0 : index
    %11 = vector.load %arg5[%c0_9, %c0_10] : memref<1x128xf32, #tpu.memory_space<vmem>>, vector<1x128xf32>
    %12 = vector.broadcast %11 : vector<1x128xf32> to vector<16x128xf32>
    %13 = arith.addf %10, %12 : vector<16x128xf32>
    %cst_11 = arith.constant 0.000000e+00 : f32
    %14 = vector.broadcast %cst_11 : f32 to vector<16x128xf32>
    %15 = arith.maximumf %13, %14 : vector<16x128xf32>
    %16 = arith.truncf %15 : vector<16x128xf32> to vector<16x128xbf16>
    %c0_12 = arith.constant 0 : index
    %c0_13 = arith.constant 0 : index
    %17 = vector.load %arg6[%c0_12, %c0_13] : memref<128x32xbf16, #tpu.memory_space<vmem>>, vector<128x32xbf16>
    %cst_14 = arith.constant dense<0.000000e+00> : vector<16x32xf32>
    %18 = tpu.matmul %16, %17, %cst_14 {dimension_numbers = #tpu.dot_dimension_numbers<[1], [0], [0], [1], [0, 0, 1, 1], [], []>} : vector<16x128xbf16>, vector<128x32xbf16>, vector<16x32xf32> -> vector<16x32xf32>
    %c0_15 = arith.constant 0 : index
    %c0_16 = arith.constant 0 : index
    %19 = vector.load %arg7[%c0_15, %c0_16] : memref<1x32xf32, #tpu.memory_space<vmem>>, vector<1x32xf32>
    %20 = vector.broadcast %19 : vector<1x32xf32> to vector<16x32xf32>
    %21 = arith.addf %18, %20 : vector<16x32xf32>
    %22 = arith.truncf %21 : vector<16x32xf32> to vector<16x32xbf16>
    %c0_17 = arith.constant 0 : index
    %c0_18 = arith.constant 0 : index
    %23 = vector.load %arg8[%c0_17, %c0_18] : memref<32x128xbf16, #tpu.memory_space<vmem>>, vector<32x128xbf16>
    %cst_19 = arith.constant dense<0.000000e+00> : vector<16x128xf32>
    %24 = tpu.matmul %22, %23, %cst_19 {dimension_numbers = #tpu.dot_dimension_numbers<[1], [0], [0], [1], [0, 0, 1, 1], [], []>} : vector<16x32xbf16>, vector<32x128xbf16>, vector<16x128xf32> -> vector<16x128xf32>
    %c0_20 = arith.constant 0 : index
    %c0_21 = arith.constant 0 : index
    %25 = vector.load %arg9[%c0_20, %c0_21] : memref<1x128xf32, #tpu.memory_space<vmem>>, vector<1x128xf32>
    %26 = vector.broadcast %25 : vector<1x128xf32> to vector<16x128xf32>
    %27 = arith.addf %24, %26 : vector<16x128xf32>
    %cst_22 = arith.constant 0.000000e+00 : f32
    %28 = vector.broadcast %cst_22 : f32 to vector<16x128xf32>
    %29 = arith.maximumf %27, %28 : vector<16x128xf32>
    %30 = arith.truncf %29 : vector<16x128xf32> to vector<16x128xbf16>
    %c0_23 = arith.constant 0 : index
    %c0_24 = arith.constant 0 : index
    %31 = vector.load %arg10[%c0_23, %c0_24] : memref<128x128xbf16, #tpu.memory_space<vmem>>, vector<128x128xbf16>
    %cst_25 = arith.constant dense<0.000000e+00> : vector<16x128xf32>
    %32 = tpu.matmul %30, %31, %cst_25 {dimension_numbers = #tpu.dot_dimension_numbers<[1], [0], [0], [1], [0, 0, 1, 1], [], []>} : vector<16x128xbf16>, vector<128x128xbf16>, vector<16x128xf32> -> vector<16x128xf32>
    %c0_26 = arith.constant 0 : index
    %c0_27 = arith.constant 0 : index
    %33 = vector.load %arg11[%c0_26, %c0_27] : memref<1x128xf32, #tpu.memory_space<vmem>>, vector<1x128xf32>
    %34 = vector.broadcast %33 : vector<1x128xf32> to vector<16x128xf32>
    %35 = arith.addf %32, %34 : vector<16x128xf32>
    %cst_28 = arith.constant 0.000000e+00 : f32
    %36 = vector.broadcast %cst_28 : f32 to vector<16x128xf32>
    %37 = arith.maximumf %35, %36 : vector<16x128xf32>
    %38 = arith.truncf %37 : vector<16x128xf32> to vector<16x128xbf16>
    %c0_29 = arith.constant 0 : index
    %c0_30 = arith.constant 0 : index
    %39 = vector.load %arg12[%c0_29, %c0_30] : memref<128x8xbf16, #tpu.memory_space<vmem>>, vector<128x8xbf16>
    %cst_31 = arith.constant dense<0.000000e+00> : vector<16x8xf32>
    %40 = tpu.matmul %38, %39, %cst_31 {dimension_numbers = #tpu.dot_dimension_numbers<[1], [0], [0], [1], [0, 0, 1, 1], [], []>} : vector<16x128xbf16>, vector<128x8xbf16>, vector<16x8xf32> -> vector<16x8xf32>
    %c0_32 = arith.constant 0 : index
    %c0_33 = arith.constant 0 : index
    %41 = vector.load %arg13[%c0_32, %c0_33] : memref<1x8xf32, #tpu.memory_space<vmem>>, vector<1x8xf32>
    %42 = vector.broadcast %41 : vector<1x8xf32> to vector<16x8xf32>
    %43 = arith.addf %40, %42 : vector<16x8xf32>
    %44 = arith.truncf %43 : vector<16x8xf32> to vector<16x8xbf16>
    %c0_34 = arith.constant 0 : index
    %c0_35 = arith.constant 0 : index
    %45 = vector.load %arg14[%c0_34, %c0_35] : memref<8x128xbf16, #tpu.memory_space<vmem>>, vector<8x128xbf16>
    %cst_36 = arith.constant dense<0.000000e+00> : vector<16x128xf32>
    %46 = tpu.matmul %44, %45, %cst_36 {dimension_numbers = #tpu.dot_dimension_numbers<[1], [0], [0], [1], [0, 0, 1, 1], [], []>} : vector<16x8xbf16>, vector<8x128xbf16>, vector<16x128xf32> -> vector<16x128xf32>
    %47 = arith.truncf %21 : vector<16x32xf32> to vector<16x32xbf16>
    %c0_37 = arith.constant 0 : index
    %c0_38 = arith.constant 0 : index
    %48 = vector.load %arg15[%c0_37, %c0_38] : memref<32x128xbf16, #tpu.memory_space<vmem>>, vector<32x128xbf16>
    %cst_39 = arith.constant dense<0.000000e+00> : vector<16x128xf32>
    %49 = tpu.matmul %47, %48, %cst_39 {dimension_numbers = #tpu.dot_dimension_numbers<[1], [0], [0], [1], [0, 0, 1, 1], [], []>} : vector<16x32xbf16>, vector<32x128xbf16>, vector<16x128xf32> -> vector<16x128xf32>
    %50 = arith.addf %46, %49 : vector<16x128xf32>
    %c0_40 = arith.constant 0 : index
    %c0_41 = arith.constant 0 : index
    %51 = vector.load %arg16[%c0_40, %c0_41] : memref<1x128xf32, #tpu.memory_space<vmem>>, vector<1x128xf32>
    %52 = vector.broadcast %51 : vector<1x128xf32> to vector<16x128xf32>
    %53 = arith.addf %50, %52 : vector<16x128xf32>
    %cst_42 = arith.constant 0.000000e+00 : f32
    %54 = vector.broadcast %cst_42 : f32 to vector<16x128xf32>
    %55 = arith.maximumf %53, %54 : vector<16x128xf32>
    %56 = arith.truncf %55 : vector<16x128xf32> to vector<16x128xbf16>
    %c0_43 = arith.constant 0 : index
    %c0_44 = arith.constant 0 : index
    %57 = vector.load %arg17[%c0_43, %c0_44] : memref<128x128xbf16, #tpu.memory_space<vmem>>, vector<128x128xbf16>
    %cst_45 = arith.constant dense<0.000000e+00> : vector<16x128xf32>
    %58 = tpu.matmul %56, %57, %cst_45 {dimension_numbers = #tpu.dot_dimension_numbers<[1], [0], [0], [1], [0, 0, 1, 1], [], []>} : vector<16x128xbf16>, vector<128x128xbf16>, vector<16x128xf32> -> vector<16x128xf32>
    %c0_46 = arith.constant 0 : index
    %c0_47 = arith.constant 0 : index
    %59 = vector.load %arg18[%c0_46, %c0_47] : memref<1x128xf32, #tpu.memory_space<vmem>>, vector<1x128xf32>
    %60 = vector.broadcast %59 : vector<1x128xf32> to vector<16x128xf32>
    %61 = arith.addf %58, %60 : vector<16x128xf32>
    %cst_48 = arith.constant 0.000000e+00 : f32
    %62 = vector.broadcast %cst_48 : f32 to vector<16x128xf32>
    %63 = arith.maximumf %61, %62 : vector<16x128xf32>
    %64 = arith.truncf %63 : vector<16x128xf32> to vector<16x128xbf16>
    %c0_49 = arith.constant 0 : index
    %c0_50 = arith.constant 0 : index
    %65 = vector.load %arg19[%c0_49, %c0_50] : memref<128x16xbf16, #tpu.memory_space<vmem>>, vector<128x16xbf16>
    %cst_51 = arith.constant dense<0.000000e+00> : vector<16x16xf32>
    %66 = tpu.matmul %64, %65, %cst_51 {dimension_numbers = #tpu.dot_dimension_numbers<[1], [0], [0], [1], [0, 0, 1, 1], [], []>} : vector<16x128xbf16>, vector<128x16xbf16>, vector<16x16xf32> -> vector<16x16xf32>
    %c0_52 = arith.constant 0 : index
    %c0_53 = arith.constant 0 : index
    %67 = vector.load %arg20[%c0_52, %c0_53] : memref<1x16xf32, #tpu.memory_space<vmem>>, vector<1x16xf32>
    %68 = vector.broadcast %67 : vector<1x16xf32> to vector<16x16xf32>
    %69 = arith.addf %66, %68 : vector<16x16xf32>
    %c0_54 = arith.constant 0 : index
    %c0_55 = arith.constant 0 : index
    %70 = vector.load %arg21[%c0_54, %c0_55] : memref<16x128xf32, #tpu.memory_space<vmem>>, vector<16x16xf32>
    tpu.vector_store %arg21[%c0_54, %c0_55], %69 {strides = array<i32>} : memref<16x128xf32, #tpu.memory_space<vmem>>, vector<16x16xf32>,
    %c0_56 = arith.constant 0 : index
    %c16 = arith.constant 16 : index
    %71 = vector.load %arg21[%c0_56, %c16] : memref<16x128xf32, #tpu.memory_space<vmem>>, vector<16x8xf32>
    tpu.vector_store %arg21[%c0_56, %c16], %43 {strides = array<i32>} : memref<16x128xf32, #tpu.memory_space<vmem>>, vector<16x8xf32>,
    return
  }
  func.func @transform_0(%arg0: i32) -> (i32, i32) {
    %c0_i32 = arith.constant 0 : i32
    %c0_i32_0 = arith.constant 0 : i32
    return %arg0, %c0_i32 : i32, i32
  }
  func.func @transform_1(%arg0: i32) -> (i32, i32) {
    %c0_i32 = arith.constant 0 : i32
    %c0_i32_0 = arith.constant 0 : i32
    %c0_i32_1 = arith.constant 0 : i32
    return %c0_i32, %c0_i32_0 : i32, i32
  }
  func.func @transform_2(%arg0: i32) -> (i32, i32) {
    %c0_i32 = arith.constant 0 : i32
    %c0_i32_0 = arith.constant 0 : i32
    %c0_i32_1 = arith.constant 0 : i32
    return %c0_i32, %c0_i32_0 : i32, i32
  }
  func.func @transform_3(%arg0: i32) -> (i32, i32) {
    %c0_i32 = arith.constant 0 : i32
    %c0_i32_0 = arith.constant 0 : i32
    %c0_i32_1 = arith.constant 0 : i32
    return %c0_i32, %c0_i32_0 : i32, i32
  }
  func.func @transform_4(%arg0: i32) -> (i32, i32) {
    %c0_i32 = arith.constant 0 : i32
    %c0_i32_0 = arith.constant 0 : i32
    %c0_i32_1 = arith.constant 0 : i32
    return %c0_i32, %c0_i32_0 : i32, i32
  }
  func.func @transform_5(%arg0: i32) -> (i32, i32) {
    %c0_i32 = arith.constant 0 : i32
    %c0_i32_0 = arith.constant 0 : i32
    %c0_i32_1 = arith.constant 0 : i32
    return %c0_i32, %c0_i32_0 : i32, i32
  }
  func.func @transform_6(%arg0: i32) -> (i32, i32) {
    %c0_i32 = arith.constant 0 : i32
    %c0_i32_0 = arith.constant 0 : i32
    %c0_i32_1 = arith.constant 0 : i32
    return %c0_i32, %c0_i32_0 : i32, i32
  }
  func.func @transform_7(%arg0: i32) -> (i32, i32) {
    %c0_i32 = arith.constant 0 : i32
    %c0_i32_0 = arith.constant 0 : i32
    %c0_i32_1 = arith.constant 0 : i32
    return %c0_i32, %c0_i32_0 : i32, i32
  }
  func.func @transform_8(%arg0: i32) -> (i32, i32) {
    %c0_i32 = arith.constant 0 : i32
    %c0_i32_0 = arith.constant 0 : i32
    %c0_i32_1 = arith.constant 0 : i32
    return %c0_i32, %c0_i32_0 : i32, i32
  }
  func.func @transform_9(%arg0: i32) -> (i32, i32) {
    %c0_i32 = arith.constant 0 : i32
    %c0_i32_0 = arith.constant 0 : i32
    %c0_i32_1 = arith.constant 0 : i32
    return %c0_i32, %c0_i32_0 : i32, i32
  }
  func.func @transform_10(%arg0: i32) -> (i32, i32) {
    %c0_i32 = arith.constant 0 : i32
    %c0_i32_0 = arith.constant 0 : i32
    %c0_i32_1 = arith.constant 0 : i32
    return %c0_i32, %c0_i32_0 : i32, i32
  }
  func.func @transform_11(%arg0: i32) -> (i32, i32) {
    %c0_i32 = arith.constant 0 : i32
    %c0_i32_0 = arith.constant 0 : i32
    %c0_i32_1 = arith.constant 0 : i32
    return %c0_i32, %c0_i32_0 : i32, i32
  }
  func.func @transform_12(%arg0: i32) -> (i32, i32) {
    %c0_i32 = arith.constant 0 : i32
    %c0_i32_0 = arith.constant 0 : i32
    %c0_i32_1 = arith.constant 0 : i32
    return %c0_i32, %c0_i32_0 : i32, i32
  }
  func.func @transform_13(%arg0: i32) -> (i32, i32) {
    %c0_i32 = arith.constant 0 : i32
    %c0_i32_0 = arith.constant 0 : i32
    %c0_i32_1 = arith.constant 0 : i32
    return %c0_i32, %c0_i32_0 : i32, i32
  }
  func.func @transform_14(%arg0: i32) -> (i32, i32) {
    %c0_i32 = arith.constant 0 : i32
    %c0_i32_0 = arith.constant 0 : i32
    %c0_i32_1 = arith.constant 0 : i32
    return %c0_i32, %c0_i32_0 : i32, i32
  }
  func.func @transform_15(%arg0: i32) -> (i32, i32) {
    %c0_i32 = arith.constant 0 : i32
    %c0_i32_0 = arith.constant 0 : i32
    %c0_i32_1 = arith.constant 0 : i32
    return %c0_i32, %c0_i32_0 : i32, i32
  }
  func.func @transform_16(%arg0: i32) -> (i32, i32) {
    %c0_i32 = arith.constant 0 : i32
    %c0_i32_0 = arith.constant 0 : i32
    %c0_i32_1 = arith.constant 0 : i32
    return %c0_i32, %c0_i32_0 : i32, i32
  }
  func.func @transform_17(%arg0: i32) -> (i32, i32) {
    %c0_i32 = arith.constant 0 : i32
    %c0_i32_0 = arith.constant 0 : i32
    %c0_i32_1 = arith.constant 0 : i32
    return %c0_i32, %c0_i32_0 : i32, i32
  }
  func.func @transform_18(%arg0: i32) -> (i32, i32) {
    %c0_i32 = arith.constant 0 : i32
    %c0_i32_0 = arith.constant 0 : i32
    %c0_i32_1 = arith.constant 0 : i32
    return %c0_i32, %c0_i32_0 : i32, i32
  }
  func.func @transform_19(%arg0: i32) -> (i32, i32) {
    %c0_i32 = arith.constant 0 : i32
    %c0_i32_0 = arith.constant 0 : i32
    %c0_i32_1 = arith.constant 0 : i32
    return %c0_i32, %c0_i32_0 : i32, i32
  }
  func.func @transform_20(%arg0: i32) -> (i32, i32) {
    %c0_i32 = arith.constant 0 : i32
    %c0_i32_0 = arith.constant 0 : i32
    return %arg0, %c0_i32 : i32, i32
  }
}

</mosaic_0001>

<bundles_post_ra>
// kernel: autoencoder_forward.1
= control target key start
LH: loop header
LB: loop body
LE: loop exit
PB: predicated region body
PF: predicated region fallthrough
CT: control target
= control target key end

     0   :  { %s1759_s0 = inlined_call_operand.vmem [shape: bf16[16,32], index: 0, kind: input, shape index: {}]   ;;  %s1760_s1 = inlined_call_operand.vmem [shape: bf16[32,128], index: 1, kind: input, shape index: {}]   ;;  %s1761_s2 = inlined_call_operand.hbm [shape: f32[1,128], index: 2, kind: input, shape index: {}]   ;;  %s1762_s3 = inlined_call_operand.vmem [shape: bf16[128,128], index: 3, kind: input, shape index: {}]   ;;  %s1763_s4 = inlined_call_operand.hbm [shape: f32[1,128], index: 4, kind: input, shape index: {}]   ;;  %s1764_s5 = inlined_call_operand.vmem [shape: bf16[128,32], index: 5, kind: input, shape index: {}]   ;;  %s1765_s6 = inlined_call_operand.hbm [shape: f32[1,32], index: 6, kind: input, shape index: {}]   ;;  %s1766_s7 = inlined_call_operand.vmem [shape: bf16[32,128], index: 7, kind: input, shape index: {}]   ;;  %s1767_s8 = inlined_call_operand.hbm [shape: f32[1,128], index: 8, kind: input, shape index: {}]   ;;  %s1768_s9 = inlined_call_operand.vmem [shape: bf16[128,128], index: 9, kind: input, shape index: {}]   ;;  %s1769_s10 = inlined_call_operand.hbm [shape: f32[1,128], index: 10, kind: input, shape index: {}]   ;;  %s1770_s11 = inlined_call_operand.vmem [shape: bf16[128,8], index: 11, kind: input, shape index: {}]   ;;  %s1771_s12 = inlined_call_operand.hbm [shape: f32[1,8], index: 12, kind: input, shape index: {}]   ;;  %s1772_s13 = inlined_call_operand.vmem [shape: bf16[8,128], index: 13, kind: input, shape index: {}]   ;;  %s1773_s14 = inlined_call_operand.hbm [shape: bf16[32,128], index: 14, kind: input, shape index: {}]   ;;  %s1774_s15 = inlined_call_operand.hbm [shape: f32[1,128], index: 15, kind: input, shape index: {}]   ;;  %s1775_s16 = inlined_call_operand.vmem [shape: bf16[128,128], index: 16, kind: input, shape index: {}]   ;;  %s1776_s17 = inlined_call_operand.hbm [shape: f32[1,128], index: 17, kind: input, shape index: {}]   ;;  %s1777_s18 = inlined_call_operand.vmem [shape: bf16[128,16], index: 18, kind: input, shape index: {}]   ;;  %s1778_s19 = inlined_call_operand.hbm [shape: f32[1,16], index: 19, kind: input, shape index: {}]   ;;  %s1779_s20 = inlined_call_operand.vmem [shape: f32[16,128], index: 20, kind: output, shape index: {}]  }
   0x1   :  { %1782 = sst [smem:[#allocation24_spill]] %s1759_s0 }
   0x2   :  { %1783 = sst [smem:[#allocation25_spill]] %s1760_s1 }
   0x3   :  { %1784 = sst [smem:[#allocation26_spill]] %s1761_s2 }
   0x4   :  { %1785 = sst [smem:[#allocation27_spill]] %s1762_s3 }
   0x5   :  { %1786 = sst [smem:[#allocation28_spill]] %s1763_s4 }
   0x6   :  { %25 = vsyncpa [#allocation3], 0 }
   0x7   :  { %26 = vsyncpa [#allocation5], 0 }
   0x8   :  { %27 = vsyncpa [#allocation8], 0 }
   0x9   :  { %28 = vsyncpa [#allocation11], 0 }
   0xa   :  { %29 = vsyncpa [#allocation14], 0  ;;  %s1787_s23 = sld [smem:[#allocation28_spill]] }
  0x10   :  { %s53_s24 = sshll.u32 %s1787_s23, 4  ;;  %s54_s24 = int_to_ptr.hbm [resolvable:$true] %s53_s24 }
  0x11   :  { %30 = vsyncpa [#allocation17], 0  ;;  %s1434_s2 = smov [#allocation4]   ;;  %s79_s27 = sshll.u32 %s1767_s8, 4  ;;  %s80_s27 = int_to_ptr.hbm [resolvable:$true] %s79_s27 }
  0x12   :  { %s55_s25 = sshll.u32 %s1434_s2, 4  ;;  %s1435_s28 = smov [#allocation7]   ;;  %s56_s25 = int_to_ptr.vmem [resolvable:$true] %s55_s25 }
  0x13   :  { %58 = dma.hbm_to_vmem [thread:$0]  %s54_s24, 16, %s56_s25, [#allocation5]  }
  0x14   :  { %s81_s4 = sshll.u32 %s1435_s28, 4  ;;  %s105_s0 = sshll.u32 %s1771_s12, 4  ;;  %s82_s4 = int_to_ptr.vmem [resolvable:$true] %s81_s4  ;;  %s106_s0 = int_to_ptr.hbm [resolvable:$true] %s105_s0 }
  0x15   :  { %84 = dma.hbm_to_vmem [thread:$0]  %s80_s27, 16, %s82_s4, [#allocation8]  }
  0x16   :  { %s131_s22 = sshll.u32 %s1774_s15, 4  ;;  %s1436_s23 = smov [#allocation10]   ;;  %s132_s22 = int_to_ptr.hbm [resolvable:$true] %s131_s22 }
  0x17   :  { %s107_s2 = sshll.u32 %s1436_s23, 4  ;;  %s1437_s8 = smov [#allocation13]   ;;  %s108_s2 = int_to_ptr.vmem [resolvable:$true] %s107_s2 }
  0x18   :  { %110 = dma.hbm_to_vmem [thread:$0]  %s106_s0, 16, %s108_s2, [#allocation11]  }
  0x19   :  { %s133_s24 = sshll.u32 %s1437_s8, 4  ;;  %s1788_s26 = sld [smem:[#allocation26_spill]]  ;;  %s134_s24 = int_to_ptr.vmem [resolvable:$true] %s133_s24 }
  0x1a   :  { %136 = dma.hbm_to_vmem [thread:$0]  %s132_s22, 16, %s134_s24, [#allocation14]  }
  0x1b   :  { %s66_s4 = sshll.u32 %s1765_s6, 4  ;;  %s1438_s29 = smov [#allocation2]   ;;  %s67_s4 = int_to_ptr.hbm [resolvable:$true] %s66_s4 }
  0x1c   :  { %s42_s15 = sshll.u32 %s1438_s29, 4  ;;  %s1439_s30 = smov [#allocation6]   ;;  %s43_s15 = int_to_ptr.vmem [resolvable:$true] %s42_s15 }
  0x1d   :  { %s68_s0 = sshll.u32 %s1439_s30, 4  ;;  %s92_s23 = sshll.u32 %s1769_s10, 4  ;;  %s69_s0 = int_to_ptr.vmem [resolvable:$true] %s68_s0  ;;  %s93_s23 = int_to_ptr.hbm [resolvable:$true] %s92_s23 }
  0x1e   :  { %71 = dma.hbm_to_vmem [thread:$0]  %s67_s4, 16, %s69_s0, [#allocation5]  }
  0x1f   :  { %s40_s28 = sshll.u32 %s1788_s26, 4  ;;  %s117_s8 = sshll.u32 %s1773_s14, 4  ;;  %s41_s28 = int_to_ptr.hbm [resolvable:$true] %s40_s28  ;;  %s118_s8 = int_to_ptr.hbm [resolvable:$true] %s117_s8 }
  0x20   :  { %45 = dma.hbm_to_vmem [thread:$0]  %s41_s28, 16, %s43_s15, [#allocation3]  }
  0x21   :  { %s1440_s24 = smov [#allocation9]   ;;  %s1441_s25 = smov [#allocation12]  }
  0x22   :  { %s94_s6 = sshll.u32 %s1440_s24, 4  ;;  %s119_s3 = sshll.u32 %s1441_s25, 4  ;;  %s95_s6 = int_to_ptr.vmem [resolvable:$true] %s94_s6  ;;  %s120_s3 = int_to_ptr.vmem [resolvable:$true] %s119_s3 }
  0x23   :  { %97 = dma.hbm_to_vmem [thread:$0]  %s93_s23, 16, %s95_s6, [#allocation8]  }
  0x24   :  { %s1442_s26 = smov 64   ;;  %s1443_s28 = smov 4  }
  0x25   :  { %125 = dma.hbm_to_vmem [thread:$0]  %s118_s8, 256, %s120_s3, [#allocation11], %s1442_s26, %s1442_s26, %s1443_s28  }
  0x26   :  { %s144_s27 = sshll.u32 %s1776_s17, 4  ;;  %s1444_s4 = smov [#allocation15]   ;;  %s145_s27 = int_to_ptr.hbm [resolvable:$true] %s144_s27 }
  0x27   :  { %s146_s29 = sshll.u32 %s1444_s4, 4  ;;  %s157_s30 = sshll.u32 %s1778_s19, 4  ;;  %s147_s29 = int_to_ptr.vmem [resolvable:$true] %s146_s29  ;;  %s158_s30 = int_to_ptr.hbm [resolvable:$true] %s157_s30 }
  0x28   :  { %149 = dma.hbm_to_vmem [thread:$0]  %s145_s27, 16, %s147_s29, [#allocation14]  }
  0x29   :  { %s1445_s0 = smov [#allocation16]  }
  0x2a   :  { %s159_s21 = sshll.u32 %s1445_s0, 4  ;;  %s160_s21 = int_to_ptr.vmem [resolvable:$true] %s159_s21 }
  0x2b   :  { %162 = dma.hbm_to_vmem [thread:$0]  %s158_s30, 16, %s160_s21, [#allocation17]  }
  0x2c   :  { %1422 = dma.done.wait [#allocation3], 16  }
  0x2d   :  { %1423 = vsyncadd [#allocation3], 4294967280 }
  0x2e   :  { %1424 = dma.done.wait [#allocation5], 32  }
  0x2f   :  { %1425 = vsyncadd [#allocation5], 4294967264 }
  0x30   :  { %1426 = dma.done.wait [#allocation8], 32  }
  0x31   :  { %1427 = vsyncadd [#allocation8], 4294967264 }
  0x32   :  { %1428 = dma.done.wait [#allocation11], 272  }
  0x33   :  { %1429 = vsyncadd [#allocation11], 4294967024 }
  0x34   :  { %1430 = dma.done.wait [#allocation14], 32  }
  0x35   :  { %1431 = vsyncadd [#allocation14], 4294967264 }
  0x36   :  { %1432 = dma.done.wait [#allocation17], 16  }
  0x37   :  { %1433 = vsyncadd [#allocation17], 4294967280  ;;  %s1789_s1 = sld [smem:[#allocation25_spill]]  ;;  %vm231_vm0 = vcmask 261120   ;;  %v1123_v11 = vld [vmem:[%s1764_s5 + $0x38] sm:$0xff]  ;;  %v1122_v12 = vld [vmem:[%s1764_s5 + $0x30] sm:$0xff] }
  0x38   :  { %s1790_s24 = sld [smem:[#allocation27_spill]]  ;;  %405 = vmatpush.bf16.msra.mxu2 %v1123_v11  ;;  %v1121_v13 = vld [vmem:[%s1764_s5 + $0x28] sm:$0xff]  ;;  %v1120_v14 = vld [vmem:[%s1764_s5 + $0x20] sm:$0xff]  ;;  %v1119_v23 = vld [vmem:[%s1764_s5 + $0x18] sm:$0xff]  ;;  %vm663_vm1 = vcmask 1043456   ;;  %vm659_vm2 = vcmask 64512  }
  0x39   :  { %s1791_s3 = sld [smem:[#allocation24_spill]]  ;;  %v1173_v16 = vld [vmem:[#allocation2] ss:$0 sm:$0xff]  ;;  %v1118_v24 = vld [vmem:[%s1764_s5 + $0x10] sm:$0xff]  ;;  %v1117_v25 = vld [vmem:[%s1764_s5 + $0x8] sm:$0xff]  ;;  %vm857_vm3 = vcmask 130048  }
  0x3a   :  { %v1116_v26 = vld [vmem:[%s1764_s5] sm:$0xff]  ;;  %v1125_v27 = vld [vmem:[%s1766_s7 + $0x8] sm:$0xff]  ;;  %v1143_v37 = vld [vmem:[#allocation12 + $0x8] sm:$0xff]  ;;  %vm868_vm4 = vcmask 195712  }
  0x3b   :  { %v1174_v29 = vld [vmem:[#allocation4] ss:$0 sm:$0xff]  ;;  %v1142_v38 = vld [vmem:[#allocation12] sm:$0xff]  ;;  %v1133_v39 = vld [vmem:[%s1768_s9 + $0x38] sm:$0xff] }
  0x3c   :  { %406 = vmatpush.bf16.msra.mxu2 %v1122_v12  ;;  %v1124_v36 = vld [vmem:[%s1766_s7] sm:$0xff]  ;;  %528 = vmatpush.bf16.msra.mxu0 %v1133_v39  ;;  %v1132_v40 = vld [vmem:[%s1768_s9 + $0x30] sm:$0xff]  ;;  %v1131_v41 = vld [vmem:[%s1768_s9 + $0x28] sm:$0xff] }
  0x3d   :  { %v1107_v0 = vld [vmem:[%s1789_s1 + $0x8] sm:$0xff]  ;;  %v1106_v1 = vld [vmem:[%s1789_s1] sm:$0xff]  ;;  %v1129_v49 = vld [vmem:[%s1768_s9 + $0x18] sm:$0xff] }
  0x3e   :  { %241 = vmatpush.bf16.msra.mxu1 %v1107_v0  ;;  %v1115_v2 = vld [vmem:[%s1790_s24 + $0x38] sm:$0xff]  ;;  %v1114_v4 = vld [vmem:[%s1790_s24 + $0x30] sm:$0xff]  ;;  %v1113_v5 = vld [vmem:[%s1790_s24 + $0x28] sm:$0xff] }
  0x3f   :  { %v1105_v3 = vld [vmem:[%s1791_s3] sm:$0xff]  ;;  %v1111_v7 = vld [vmem:[%s1790_s24 + $0x18] sm:$0xff]  ;;  %v1110_v8 = vld [vmem:[%s1790_s24 + $0x10] sm:$0xff] }
  0x40   :  { %v1112_v6 = vld [vmem:[%s1790_s24 + $0x20] sm:$0xff]  ;;  %v1109_v9 = vld [vmem:[%s1790_s24 + $0x8] sm:$0xff]  ;;  %407 = vmatpush.bf16.msra.mxu2 %v1121_v13  ;;  %529 = vmatpush.bf16.msra.mxu0 %v1132_v40  ;;  %v1128_v50 = vld [vmem:[%s1768_s9 + $0x10] sm:$0xff] }
  0x41   :  { %v1108_v10 = vld [vmem:[%s1790_s24] sm:$0xff]  ;;  %v1127_v51 = vld [vmem:[%s1768_s9 + $0x8] sm:$0xff]  ;;  %v1141_v53 = vld [vmem:[%s1770_s11 + $0x38] sm:$0xff] }
  0x42   :  { %242 = vmatpush.bf16.msra.mxu1 %v1106_v1  ;;  %v1175_v43 = vld [vmem:[#allocation6] ss:$0 sm:$0xff]  ;;  %613 = vmatpush.bf16.msra.mxu3 %v1141_v53  ;;  %v1140_v54 = vld [vmem:[%s1770_s11 + $0x30] sm:$0xff]  ;;  %v1139_v55 = vld [vmem:[%s1770_s11 + $0x28] sm:$0xff] }
  0x43   :  { %v1130_v48 = vld [vmem:[%s1768_s9 + $0x20] sm:$0xff]  ;;  %v1137_v1 = vld [vmem:[%s1770_s11 + $0x18] sm:$0xff] }
  0x44   :  { %408 = vmatpush.bf16.msra.mxu2 %v1120_v14  ;;  %530 = vmatpush.bf16.msra.mxu0 %v1131_v41  ;;  %v1126_v52 = vld [vmem:[%s1768_s9] sm:$0xff] }
  0x45   :  { %893 = vmatmul.msk.bf16.vlgmr.msra.gmra.mxu1 %vm231_vm0, %v1105_v3  ;;  %v1138_v56 = vld [vmem:[%s1770_s11 + $0x20] sm:$0xff]  ;;  %v1135_v3 = vld [vmem:[%s1770_s11 + $0x8] sm:$0xff] }
  0x46   :  { %320 = vmatpush.bf16.msrb.mxu1 %v1115_v2  ;;  %614 = vmatpush.bf16.msra.mxu3 %v1140_v54  ;;  %v1176_v58 = vld [vmem:[#allocation7] ss:$0 sm:$0xff]  ;;  %v1136_v2 = vld [vmem:[%s1770_s11 + $0x10] sm:$0xff] }
  0x48   :  { %409 = vmatpush.bf16.msra.mxu2 %v1119_v23  ;;  %531 = vmatpush.bf16.msra.mxu0 %v1130_v48  ;;  %v1149_v23 = vld [vmem:[%s1775_s16 + $0x28] sm:$0xff]  ;;  %v1152_v48 = vld [vmem:[%s1777_s18] sm:$0xff] }
  0x4a   :  { %321 = vmatpush.bf16.msrb.mxu1 %v1114_v4  ;;  %615 = vmatpush.bf16.msra.mxu3 %v1139_v55  ;;  %v1134_v4 = vld [vmem:[%s1770_s11] sm:$0xff]  ;;  %s1446_s11 = smov 16  }
  0x4c   :  { %410 = vmatpush.bf16.msra.mxu2 %v1118_v24  ;;  %532 = vmatpush.bf16.msra.mxu0 %v1129_v49  ;;  %v1148_v24 = vld [vmem:[%s1775_s16 + $0x20] sm:$0xff] }
  0x4e   :  { %322 = vmatpush.bf16.msrb.mxu1 %v1113_v5  ;;  %616 = vmatpush.bf16.msra.mxu3 %v1138_v56  ;;  %v628_v5 = vld [vmem:[%s1772_s13] sm:$0xf] }
  0x50   :  { %411 = vmatpush.bf16.msra.mxu2 %v1117_v25  ;;  %533 = vmatpush.bf16.msra.mxu0 %v1128_v50  ;;  %v1147_v25 = vld [vmem:[%s1775_s16 + $0x18] sm:$0xff] }
  0x51   :  { %v1180_v50 = vld [vmem:[#allocation15] ss:$0 sm:$0xff] }
  0x52   :  { %323 = vmatpush.bf16.msrb.mxu1 %v1112_v6  ;;  %617 = vmatpush.bf16.msra.mxu3 %v1137_v1  ;;  %v665_v6 = vsel %vm663_vm1, %v628_v5, 0 }
  0x54   :  { %412 = vmatpush.bf16.msra.mxu2 %v1116_v26  ;;  %534 = vmatpush.bf16.msra.mxu0 %v1127_v51  ;;  %v1146_v26 = vld [vmem:[%s1775_s16 + $0x10] sm:$0xff] }
  0x56   :  { %324 = vmatpush.bf16.msrb.mxu1 %v1111_v7  ;;  %618 = vmatpush.bf16.msra.mxu3 %v1136_v2 }
  0x58   :  { %449 = vmatpush.bf16.msrb.mxu2 %v1125_v27  ;;  %535 = vmatpush.bf16.msra.mxu0 %v1126_v52  ;;  %v1145_v27 = vld [vmem:[%s1775_s16 + $0x8] sm:$0xff] }
  0x5a   :  { %325 = vmatpush.bf16.msrb.mxu1 %v1110_v8  ;;  %619 = vmatpush.bf16.msra.mxu3 %v1135_v3  ;;  %v1177_v8 = vld [vmem:[#allocation9] ss:$0 sm:$0xff] }
  0x5c   :  { %450 = vmatpush.bf16.msrb.mxu2 %v1124_v36  ;;  %v1179_v36 = vld [vmem:[#allocation13] ss:$0 sm:$0xff] }
  0x5e   :  { %326 = vmatpush.bf16.msrb.mxu1 %v1109_v9  ;;  %620 = vmatpush.bf16.msra.mxu3 %v1134_v4 }
  0x62   :  { %327 = vmatpush.bf16.msrb.mxu1 %v1108_v10 }
  0x66   :  { %651 = vmatpush.bf16.msra.mxu1 %v1143_v37 }
  0x6a   :  { %652 = vmatpush.bf16.msra.mxu1 %v1142_v38 }
  0xc2   :  { %v244_v15 = vpop.f32.mrf.mxu1 }
  0xc3   :  { %v245_v17 = vadd.f32 %v1173_v16, %v244_v15  ;;  %v1178_v15 = vld [vmem:[#allocation10] ss:$0 sm:$0xff] }
  0xc5   :  { %v249_v20 = vmax.f32 %v245_v17, 0.0 }
  0xca   :  { %v246_v18 = vpop.f32.mrf.mxu1 }
  0xcb   :  { %v247_v19 = vadd.f32 %v1173_v16, %v246_v18 }
  0xcd   :  { %v250_v21 = vmax.f32 %v247_v19, 0.0 }
  0xcf   :  { %v251_v22 = vpack.c.bf16 %v250_v21, %v249_v20  ;;  %v1151_v21 = vld [vmem:[%s1775_s16 + $0x38] sm:$0xff] }
  0xd0   :  { %758 = vmatpush.bf16.msrb.mxu0 %v1151_v21 }
  0xd1   :  { %328 = vmatmul.bf16.vlgmr.msrb.gmra.mxu1 %v251_v22  ;;  %v1150_v22 = vld [vmem:[%s1775_s16 + $0x30] sm:$0xff] }
  0xd4   :  { %759 = vmatpush.bf16.msrb.mxu0 %v1150_v22 }
  0xd8   :  { %760 = vmatpush.bf16.msrb.mxu0 %v1149_v23 }
  0xdc   :  { %761 = vmatpush.bf16.msrb.mxu0 %v1148_v24 }
  0xe0   :  { %762 = vmatpush.bf16.msrb.mxu0 %v1147_v25 }
  0xe4   :  { %763 = vmatpush.bf16.msrb.mxu0 %v1146_v26 }
  0xe8   :  { %764 = vmatpush.bf16.msrb.mxu0 %v1145_v27 }
 0x14e   :  { %v329_v28 = vpop.f32.mrf.mxu1 }
 0x14f   :  { %v330_v30 = vadd.f32 %v1174_v29, %v329_v28  ;;  %v1144_v28 = vld [vmem:[%s1775_s16] sm:$0xff] }
 0x150   :  { %765 = vmatpush.bf16.msrb.mxu0 %v1144_v28 }
 0x151   :  { %v334_v33 = vmax.f32 %v330_v30, 0.0  ;;  %v1158_v30 = vld [vmem:[%s1777_s18 + $0x30] sm:$0xff] }
 0x156   :  { %v331_v31 = vpop.f32.mrf.mxu1 }
 0x157   :  { %v332_v32 = vadd.f32 %v1174_v29, %v331_v31  ;;  %v1159_v29 = vld [vmem:[%s1777_s18 + $0x38] sm:$0xff]  ;;  %v1157_v31 = vld [vmem:[%s1777_s18 + $0x28] sm:$0xff] }
 0x158   :  { %843 = vmatpush.bf16.msrb.mxu3 %v1159_v29 }
 0x159   :  { %v335_v34 = vmax.f32 %v332_v32, 0.0  ;;  %v1156_v32 = vld [vmem:[%s1777_s18 + $0x20] sm:$0xff] }
 0x15b   :  { %v336_v35 = vpack.c.bf16 %v335_v34, %v334_v33 }
 0x15c   :  { %844 = vmatpush.bf16.msrb.mxu3 %v1158_v30 }
 0x15d   :  { %413 = vmatmul.bf16.vlgmr.msra.gmra.mxu2 %v336_v35 }
 0x15e   :  { %674 = vmatpush.bf16.msra.mxu2 %v665_v6 }
 0x160   :  { %845 = vmatpush.bf16.msrb.mxu3 %v1157_v31 }
 0x164   :  { %846 = vmatpush.bf16.msrb.mxu3 %v1156_v32 }
 0x1e0   :  { %v414_v42 = vpop.f32.mrf.mxu2 }
 0x1e1   :  { %v415_v45 = vadd.f32 %v1175_v43, %v414_v42 }
 0x1e8   :  { %v416_v44 = vpop.f32.mrf.mxu2 }
 0x1e9   :  { %v417_v46 = vadd.f32 %v1175_v43, %v416_v44 }
 0x1eb   :  { %v419_v47 = vpack.c.bf16 %v417_v46, %v415_v45  ;;  %v1155_v45 = vld [vmem:[%s1777_s18 + $0x18] sm:$0xff]  ;;  %v1154_v46 = vld [vmem:[%s1777_s18 + $0x10] sm:$0xff] }
 0x1ec   :  { %847 = vmatpush.bf16.msrb.mxu3 %v1155_v45 }
 0x1ed   :  { %966 = vmatmul.msk.bf16.vlgmr.msrb.gmra.mxu2 %vm231_vm0, %v419_v47  ;;  %1039 = vmatmul.msk.bf16.vlgmr.msra.gmra.mxu1 %vm231_vm0, %v419_v47  ;;  %v1153_v47 = vld [vmem:[%s1777_s18 + $0x8] sm:$0xff] }
 0x1f0   :  { %848 = vmatpush.bf16.msrb.mxu3 %v1154_v46 }
 0x1f4   :  { %849 = vmatpush.bf16.msrb.mxu3 %v1153_v47 }
 0x1f8   :  { %850 = vmatpush.bf16.msrb.mxu3 %v1152_v48 }
 0x26a   :  { %v654_v33 = vpop.f32.mrf.mxu1 }
 0x270   :  { %v452_v57 = vpop.f32.mrf.mxu2 }
 0x271   :  { %v453_v59 = vadd.f32 %v1176_v58, %v452_v57  ;;  %v1181_v57 = vld [vmem:[#allocation16] ss:$0 sm:$0xff] }
 0x272   :  { %v656_v37 = vpop.f32.mrf.mxu1 }
 0x273   :  { %v457_v62 = vmax.f32 %v453_v59, 0.0 }
 0x278   :  { %v454_v60 = vpop.f32.mrf.mxu2 }
 0x279   :  { %v455_v61 = vadd.f32 %v1176_v58, %v454_v60 }
 0x27b   :  { %v458_v63 = vmax.f32 %v455_v61, 0.0 }
 0x27d   :  { %v459_v0 = vpack.c.bf16 %v458_v63, %v457_v62 }
 0x27f   :  { %536 = vmatmul.bf16.vlgmr.msra.gmra.mxu0 %v459_v0 }
 0x2fc   :  { %v537_v7 = vpop.f32.mrf.mxu0 }
 0x2fd   :  { %v538_v9 = vadd.f32 %v1177_v8, %v537_v7 }
 0x2ff   :  { %v542_v12 = vmax.f32 %v538_v9, 0.0 }
 0x304   :  { %v539_v10 = vpop.f32.mrf.mxu0 }
 0x305   :  { %v540_v11 = vadd.f32 %v1177_v8, %v539_v10 }
 0x307   :  { %v543_v13 = vmax.f32 %v540_v11, 0.0 }
 0x309   :  { %v544_v14 = vpack.c.bf16 %v543_v13, %v542_v12 }
 0x30b   :  { %621 = vmatmul.bf16.vlgmr.msra.gmra.mxu3 %v544_v14 }
 0x38e   :  { %v622_v16 = vpop.f32.mrf.mxu3 }
 0x38f   :  { %v623_v17 = vadd.f32 %v1178_v15, %v622_v16 }
 0x391   :  { %862 = vrot.lane.b32.xlu0 %v623_v17, %s1446_s11 }
 0x396   :  { %v624_v18 = vpop.f32.mrf.mxu3 }
 0x397   :  { %v625_v19 = vadd.f32 %v1178_v15, %v624_v18 }
 0x399   :  { %v627_v20 = vpack.c.bf16 %v625_v19, %v623_v17  ;;  %864 = vrot.lane.b32.xlu0 %v625_v19, %s1446_s11 }
 0x39b   :  { %1040 = vmatmul.msk.bf16.vlgmr.msra.gmra.mxu2 %vm659_vm2, %v627_v20 }
 0x403   :  { %v863_v59 = vpop.permute.xlu0 %862 }
 0x40b   :  { %v865_v63 = vpop.permute.xlu0 %864 }
 0x41e   :  { %v676_v34 = vpop.f32.mrf.mxu2 }
 0x41f   :  { %v677_v35 = vadd.f32 %v676_v34, %v654_v33 }
 0x421   :  { %v685_v39 = vadd.f32 %v1179_v36, %v677_v35 }
 0x423   :  { %v687_v42 = vmax.f32 %v685_v39, 0.0 }
 0x426   :  { %v678_v38 = vpop.f32.mrf.mxu2 }
 0x427   :  { %v679_v40 = vadd.f32 %v678_v38, %v656_v37 }
 0x429   :  { %v686_v41 = vadd.f32 %v1179_v36, %v679_v40 }
 0x42b   :  { %v688_v43 = vmax.f32 %v686_v41, 0.0 }
 0x42d   :  { %v689_v44 = vpack.c.bf16 %v688_v43, %v687_v42 }
 0x42f   :  { %766 = vmatmul.bf16.vlgmr.msrb.gmra.mxu0 %v689_v44 }
 0x4ac   :  { %v767_v49 = vpop.f32.mrf.mxu0 }
 0x4ad   :  { %v768_v51 = vadd.f32 %v1180_v50, %v767_v49 }
 0x4af   :  { %v772_v54 = vmax.f32 %v768_v51, 0.0 }
 0x4b4   :  { %v769_v52 = vpop.f32.mrf.mxu0 }
 0x4b5   :  { %v770_v53 = vadd.f32 %v1180_v50, %v769_v52 }
 0x4b7   :  { %v773_v55 = vmax.f32 %v770_v53, 0.0 }
 0x4b9   :  { %v774_v56 = vpack.c.bf16 %v773_v55, %v772_v54 }
 0x4bb   :  { %851 = vmatmul.bf16.vlgmr.msrb.gmra.mxu3 %v774_v56 }
 0x53e   :  { %v852_v58 = vpop.f32.mrf.mxu3 }
 0x53f   :  { %v853_v60 = vadd.f32 %v1181_v57, %v852_v58 }
 0x541   :  { %858 = vst.msk [vmem:[%s1779_s20] sm:$0xff] %vm857_vm3, %v853_v60 }
 0x542   :  { %869 = vst.msk [vmem:[%s1779_s20] sm:$0xff] %vm868_vm4, %v863_v59 }
 0x546   :  { %v854_v61 = vpop.f32.mrf.mxu3 }
 0x547   :  { %v855_v62 = vadd.f32 %v1181_v57, %v854_v61 }
 0x549   :  { %859 = vst.msk [vmem:[%s1779_s20 + $0x8] sm:$0xff] %vm857_vm3, %v855_v62 }
 0x54a   :  { %870 = vst.msk [vmem:[%s1779_s20 + $0x8] sm:$0xff] %vm868_vm4, %v865_v63 }
 0x54b   :  { %875 = vsyncpa [#allocation3], 1 }
 0x54c   :  { %876 = vsyncpa [#allocation5], 1 }
 0x54d   :  { %877 = vsyncpa [#allocation8], 1 }
 0x54e   :  { %878 = vsyncpa [#allocation11], 1 }
 0x54f   :  { %879 = vsyncpa [#allocation14], 1 }
 0x550   :  { %880 = vsyncpa [#allocation17], 1 }

</bundles_post_ra>
